<compile_context>
chip_gen: v5e
topology: v5e:2x2
jax: 0.10.0
libtpu: 0.0.40
codegen_flags: <defaults>
</compile_context>

<pallas_src>
import jax
import jax.numpy as jnp
from jax.experimental import pallas as pl
from jax.experimental.pallas import tpu as pltpu

LANE = 128          # vreg lane width
SUBLANE_BF16 = 16   # bf16 sublane packing (second-minor tile dim)


def _round_up(x, m):
    return (x + m - 1) // m * m


def actor_kernel(x_ref, w1_ref, b1_ref, w2_ref, b2_ref, w3_ref, b3_ref, o_ref):
    # x is already bf16; matmuls run on the MXU with f32 accumulation, the
    # elementwise path (bias add / ReLU / tanh) stays in f32 (v5e-friendly).
    h = jnp.dot(x_ref[...], w1_ref[...], preferred_element_type=jnp.float32) + b1_ref[...]
    h = jnp.maximum(h, 0.0)
    h = jnp.dot(h.astype(jnp.bfloat16), w2_ref[...],
                preferred_element_type=jnp.float32) + b2_ref[...]
    h = jnp.maximum(h, 0.0)
    h = jnp.dot(h.astype(jnp.bfloat16), w3_ref[...],
                preferred_element_type=jnp.float32) + b3_ref[...]
    o_ref[...] = jnp.tanh(h)


def init_params(key, input_size, hidden_size, output_size):
    """Deterministic init mirroring nn.Linear default (uniform +-1/sqrt(fan_in)).

    Logical (unpadded) f32 params, weights already in [in, out] layout.
    """
    ks = jax.random.split(key, 6)

    def linear(kw, kb, fan_in, fan_out):
        bound = 1.0 / jnp.sqrt(fan_in)
        w = jax.random.uniform(kw, (fan_in, fan_out), jnp.float32, -bound, bound)
        b = jax.random.uniform(kb, (1, fan_out), jnp.float32, -bound, bound)
        return w, b

    w1, b1 = linear(ks[0], ks[1], input_size, hidden_size)
    w2, b2 = linear(ks[2], ks[3], hidden_size, hidden_size)
    w3, b3 = linear(ks[4], ks[5], hidden_size, output_size)
    return {"w1": w1, "b1": b1, "w2": w2, "b2": b2, "w3": w3, "b3": b3}


def pad_params(params):
    """One-time prep: pad ONLY the hidden dim to the 128-lane width; weights -> bf16.

    Input feature dim and output dim stay at their logical widths (full-dim blocks
    are legal), so no padded HBM traffic for activations.  Zero-padded weight
    rows/cols and zero bias padding keep the logical result exact.
    """
    w1, b1 = params["w1"], params["b1"]
    w2, b2 = params["w2"], params["b2"]
    w3, b3 = params["w3"], params["b3"]
    in_size, hidden = w1.shape
    out_size = w3.shape[1]
    h_p = _round_up(hidden, LANE)

    def pad_w(w, rows, cols):
        return jnp.pad(w, ((0, rows - w.shape[0]),
                           (0, cols - w.shape[1]))).astype(jnp.bfloat16)

    def pad_b(b, cols):
        return jnp.pad(b, ((0, 0), (0, cols - b.shape[1])))

    return {
        "w1": pad_w(w1, in_size, h_p), "b1": pad_b(b1, h_p),
        "w2": pad_w(w2, h_p, h_p),     "b2": pad_b(b2, h_p),
        "w3": pad_w(w3, h_p, out_size), "b3": b3.astype(jnp.float32),
        "in_size": int(in_size), "out_size": int(out_size),
    }


def actor_forward(state, padded, *, block_b=2048):
    """state: [B, input_size] float32; padded: output of pad_params."""
    B, in_size = state.shape
    assert in_size == padded["in_size"]
    out_size = padded["out_size"]

    # Balanced batch split: at least 2 grid steps when the batch is big enough
    # (keeps both v7x TensorCores busy) and never more than needed to fit block_b.
    min_steps = 2 if B > 2 * SUBLANE_BF16 else 1
    steps = max(pl.cdiv(B, block_b), min_steps)
    tb = _round_up(pl.cdiv(B, steps), SUBLANE_BF16)
    b_pad = _round_up(B, tb)

    # bf16 activations (halves input DMA); pad only the batch dim.
    x = state.astype(jnp.bfloat16)
    if b_pad != B:
        x = jnp.pad(x, ((0, b_pad - B), (0, 0)))

    grid = (b_pad // tb,)

    def resident(a):  # weight/bias stays in VMEM across all grid steps
        return pl.BlockSpec(a.shape, lambda i: (0,) * a.ndim)

    out = pl.pallas_call(
        actor_kernel,
        out_shape=jax.ShapeDtypeStruct((b_pad, out_size), jnp.float32),
        grid=grid,
        in_specs=[
            pl.BlockSpec((tb, in_size), lambda i: (i, 0)),   # x: tiled over batch only
            resident(padded["w1"]), resident(padded["b1"]),
            resident(padded["w2"]), resident(padded["b2"]),
            resident(padded["w3"]), resident(padded["b3"]),
        ],
        out_specs=pl.BlockSpec((tb, out_size), lambda i: (i, 0)),
        compiler_params=pltpu.CompilerParams(
            dimension_semantics=("parallel",),
            vmem_limit_bytes=32 * 1024 * 1024,
        ),
    )(x, padded["w1"], padded["b1"], padded["w2"], padded["b2"],
      padded["w3"], padded["b3"])

    return out[:B] if b_pad != B else out


def _reference(x, p):
    """Pure-JAX f32 reference of the original nn.Module forward."""
    h = jnp.maximum(x @ p["w1"] + p["b1"], 0.0)
    h = jnp.maximum(h @ p["w2"] + p["b2"], 0.0)
    return jnp.tanh(h @ p["w3"] + p["b3"])


if __name__ == "__main__":
    key = jax.random.PRNGKey(0)
    k_params, k_state, k_big, k_odd = jax.random.split(key, 4)

    # Small shapes consistent with the module.
    batch = 4
    input_size = 8
    hidden_size = 32
    output_size = 4

    params = init_params(k_params, input_size, hidden_size, output_size)
    padded = pad_params(params)

    # 1) tiny batch (single grid step, batch rows padded to a sublane multiple).
    state = jax.random.normal(k_state, (batch, input_size), jnp.float32)
    out = jax.block_until_ready(actor_forward(state, padded))
    expected = _reference(state, params)
    assert out.shape == (batch, output_size)
    # bf16 matmul operands with f32 accumulation -> loose tolerance vs f32 ref.
    assert jnp.allclose(out, expected, atol=2e-2, rtol=2e-2)

    # 2) larger batch: multi-step, megacore-parallel grid, no batch padding.
    big_batch = 512
    state_big = jax.random.normal(k_big, (big_batch, input_size), jnp.float32)
    out_big = jax.block_until_ready(actor_forward(state_big, padded))
    expected_big = _reference(state_big, params)
    assert out_big.shape == (big_batch, output_size)
    assert jnp.allclose(out_big, expected_big, atol=2e-2, rtol=2e-2)

    # 3) uneven batch: multi-step grid + discarded padded rows.
    odd_batch = 37
    state_odd = jax.random.normal(k_odd, (odd_batch, input_size), jnp.float32)
    out_odd = jax.block_until_ready(actor_forward(state_odd, padded))
    expected_odd = _reference(state_odd, params)
    assert out_odd.shape == (odd_batch, output_size)
    assert jnp.allclose(out_odd, expected_odd, atol=2e-2, rtol=2e-2)

    # TODO(synk): optim.Adam from the PyTorch module is training-side and not part
    # of the forward pass; it is intentionally not implemented here.
    print("KERNEL_OK")
</pallas_src>

<mosaic_0001>
module attributes {stable_mosaic.version = 11 : i64} {
  func.func @actor_kernel(%arg0: i32, %arg1: memref<16x8xbf16, #tpu.memory_space<vmem>>, %arg2: memref<8x128xbf16, #tpu.memory_space<vmem>>, %arg3: memref<1x128xf32, #tpu.memory_space<vmem>>, %arg4: memref<128x128xbf16, #tpu.memory_space<vmem>>, %arg5: memref<1x128xf32, #tpu.memory_space<vmem>>, %arg6: memref<128x4xbf16, #tpu.memory_space<vmem>>, %arg7: memref<1x4xf32, #tpu.memory_space<vmem>>, %arg8: memref<16x4xf32, #tpu.memory_space<vmem>>) attributes {dimension_semantics = [#tpu.dimension_semantics<parallel>], iteration_bounds = array<i64: 1>, scalar_prefetch = 0 : i64, scratch_operands = 0 : i64, tpu.core_type = #tpu.core_type<tc>, window_params = [{transform_indices = @transform_0, window_bounds = array<i64: 16, 8>}, {pipeline_mode = #tpu.pipeline_mode<synchronous>, transform_indices = @transform_1, window_bounds = array<i64: 8, 128>}, {pipeline_mode = #tpu.pipeline_mode<synchronous>, transform_indices = @transform_2, window_bounds = array<i64: 1, 128>}, {pipeline_mode = #tpu.pipeline_mode<synchronous>, transform_indices = @transform_3, window_bounds = array<i64: 128, 128>}, {pipeline_mode = #tpu.pipeline_mode<synchronous>, transform_indices = @transform_4, window_bounds = array<i64: 1, 128>}, {pipeline_mode = #tpu.pipeline_mode<synchronous>, transform_indices = @transform_5, window_bounds = array<i64: 128, 4>}, {pipeline_mode = #tpu.pipeline_mode<synchronous>, transform_indices = @transform_6, window_bounds = array<i64: 1, 4>}, {transform_indices = @transform_7, window_bounds = array<i64: 16, 4>}]} {
    %c0 = arith.constant 0 : index
    %c0_0 = arith.constant 0 : index
    %0 = vector.load %arg1[%c0, %c0_0] : memref<16x8xbf16, #tpu.memory_space<vmem>>, vector<16x8xbf16>
    %c0_1 = arith.constant 0 : index
    %c0_2 = arith.constant 0 : index
    %1 = vector.load %arg2[%c0_1, %c0_2] : memref<8x128xbf16, #tpu.memory_space<vmem>>, vector<8x128xbf16>
    %cst = arith.constant dense<0.000000e+00> : vector<16x128xf32>
    %2 = tpu.matmul %0, %1, %cst {dimension_numbers = #tpu.dot_dimension_numbers<[1], [0], [0], [1], [0, 0, 1, 1], [], []>} : vector<16x8xbf16>, vector<8x128xbf16>, vector<16x128xf32> -> vector<16x128xf32>
    %c0_3 = arith.constant 0 : index
    %c0_4 = arith.constant 0 : index
    %3 = vector.load %arg3[%c0_3, %c0_4] : memref<1x128xf32, #tpu.memory_space<vmem>>, vector<1x128xf32>
    %4 = vector.broadcast %3 : vector<1x128xf32> to vector<16x128xf32>
    %5 = arith.addf %2, %4 : vector<16x128xf32>
    %cst_5 = arith.constant 0.000000e+00 : f32
    %6 = vector.broadcast %cst_5 : f32 to vector<16x128xf32>
    %7 = arith.maximumf %5, %6 : vector<16x128xf32>
    %8 = arith.truncf %7 : vector<16x128xf32> to vector<16x128xbf16>
    %c0_6 = arith.constant 0 : index
    %c0_7 = arith.constant 0 : index
    %9 = vector.load %arg4[%c0_6, %c0_7] : memref<128x128xbf16, #tpu.memory_space<vmem>>, vector<128x128xbf16>
    %cst_8 = arith.constant dense<0.000000e+00> : vector<16x128xf32>
    %10 = tpu.matmul %8, %9, %cst_8 {dimension_numbers = #tpu.dot_dimension_numbers<[1], [0], [0], [1], [0, 0, 1, 1], [], []>} : vector<16x128xbf16>, vector<128x128xbf16>, vector<16x128xf32> -> vector<16x128xf32>
    %c0_9 = arith.constant 0 : index
    %c0_10 = arith.constant 0 : index
    %11 = vector.load %arg5[%c0_9, %c0_10] : memref<1x128xf32, #tpu.memory_space<vmem>>, vector<1x128xf32>
    %12 = vector.broadcast %11 : vector<1x128xf32> to vector<16x128xf32>
    %13 = arith.addf %10, %12 : vector<16x128xf32>
    %cst_11 = arith.constant 0.000000e+00 : f32
    %14 = vector.broadcast %cst_11 : f32 to vector<16x128xf32>
    %15 = arith.maximumf %13, %14 : vector<16x128xf32>
    %16 = arith.truncf %15 : vector<16x128xf32> to vector<16x128xbf16>
    %c0_12 = arith.constant 0 : index
    %c0_13 = arith.constant 0 : index
    %17 = vector.load %arg6[%c0_12, %c0_13] : memref<128x4xbf16, #tpu.memory_space<vmem>>, vector<128x4xbf16>
    %cst_14 = arith.constant dense<0.000000e+00> : vector<16x4xf32>
    %18 = tpu.matmul %16, %17, %cst_14 {dimension_numbers = #tpu.dot_dimension_numbers<[1], [0], [0], [1], [0, 0, 1, 1], [], []>} : vector<16x128xbf16>, vector<128x4xbf16>, vector<16x4xf32> -> vector<16x4xf32>
    %c0_15 = arith.constant 0 : index
    %c0_16 = arith.constant 0 : index
    %19 = vector.load %arg7[%c0_15, %c0_16] : memref<1x4xf32, #tpu.memory_space<vmem>>, vector<1x4xf32>
    %20 = vector.broadcast %19 : vector<1x4xf32> to vector<16x4xf32>
    %21 = arith.addf %18, %20 : vector<16x4xf32>
    %22 = math.tanh %21 : vector<16x4xf32>
    %c0_17 = arith.constant 0 : index
    %c0_18 = arith.constant 0 : index
    %23 = vector.load %arg8[%c0_17, %c0_18] : memref<16x4xf32, #tpu.memory_space<vmem>>, vector<16x4xf32>
    tpu.vector_store %arg8[%c0_17, %c0_18], %22 {strides = array<i32>} : memref<16x4xf32, #tpu.memory_space<vmem>>, vector<16x4xf32>,
    return
  }
  func.func @transform_0(%arg0: i32) -> (i32, i32) {
    %c0_i32 = arith.constant 0 : i32
    %c0_i32_0 = arith.constant 0 : i32
    return %arg0, %c0_i32 : i32, i32
  }
  func.func @transform_1(%arg0: i32) -> (i32, i32) {
    %c0_i32 = arith.constant 0 : i32
    %c0_i32_0 = arith.constant 0 : i32
    %c0_i32_1 = arith.constant 0 : i32
    return %c0_i32, %c0_i32_0 : i32, i32
  }
  func.func @transform_2(%arg0: i32) -> (i32, i32) {
    %c0_i32 = arith.constant 0 : i32
    %c0_i32_0 = arith.constant 0 : i32
    %c0_i32_1 = arith.constant 0 : i32
    return %c0_i32, %c0_i32_0 : i32, i32
  }
  func.func @transform_3(%arg0: i32) -> (i32, i32) {
    %c0_i32 = arith.constant 0 : i32
    %c0_i32_0 = arith.constant 0 : i32
    %c0_i32_1 = arith.constant 0 : i32
    return %c0_i32, %c0_i32_0 : i32, i32
  }
  func.func @transform_4(%arg0: i32) -> (i32, i32) {
    %c0_i32 = arith.constant 0 : i32
    %c0_i32_0 = arith.constant 0 : i32
    %c0_i32_1 = arith.constant 0 : i32
    return %c0_i32, %c0_i32_0 : i32, i32
  }
  func.func @transform_5(%arg0: i32) -> (i32, i32) {
    %c0_i32 = arith.constant 0 : i32
    %c0_i32_0 = arith.constant 0 : i32
    %c0_i32_1 = arith.constant 0 : i32
    return %c0_i32, %c0_i32_0 : i32, i32
  }
  func.func @transform_6(%arg0: i32) -> (i32, i32) {
    %c0_i32 = arith.constant 0 : i32
    %c0_i32_0 = arith.constant 0 : i32
    %c0_i32_1 = arith.constant 0 : i32
    return %c0_i32, %c0_i32_0 : i32, i32
  }
  func.func @transform_7(%arg0: i32) -> (i32, i32) {
    %c0_i32 = arith.constant 0 : i32
    %c0_i32_0 = arith.constant 0 : i32
    return %arg0, %c0_i32 : i32, i32
  }
}

</mosaic_0001>

<bundles_post_ra>
// kernel: tpu_custom_call.1
= control target key start
LH: loop header
LB: loop body
LE: loop exit
PB: predicated region body
PF: predicated region fallthrough
CT: control target
= control target key end

     0   :  { %vm43_vm0 = vcmask 1043456   ;;  %vm39_vm1 = vcmask 64512   ;;  %vm233_vm2 = vcmask 31744   ;;  %s442_s1 = inlined_call_operand.vmem [shape: bf16[8,128], index: 1, kind: input, shape index: {}]   ;;  %s443_s0 = inlined_call_operand.vmem [shape: bf16[16,8], index: 0, kind: input, shape index: {}]   ;;  %s444_s3 = inlined_call_operand.vmem [shape: bf16[128,128], index: 3, kind: input, shape index: {}]   ;;  %s445_s2 = inlined_call_operand.vmem [shape: f32[1,128], index: 2, kind: input, shape index: {}]   ;;  %s446_s4 = inlined_call_operand.vmem [shape: f32[1,128], index: 4, kind: input, shape index: {}]   ;;  %s447_s5 = inlined_call_operand.vmem [shape: bf16[128,4], index: 5, kind: input, shape index: {}]   ;;  %s448_s6 = inlined_call_operand.vmem [shape: f32[1,4], index: 6, kind: input, shape index: {}]   ;;  %s449_s7 = inlined_call_operand.vmem [shape: f32[16,4], index: 7, kind: output, shape index: {}]  }
   0x1   :  { %v29_v0 = vld [vmem:[%s442_s1] sm:$0xf]  ;;  %v317_v1 = vld [vmem:[%s444_s3 + $0x38] sm:$0xff]  ;;  %v316_v4 = vld [vmem:[%s444_s3 + $0x30] sm:$0xff] }
   0x2   :  { %v45_v2 = vsel %vm43_vm0, %v29_v0, 0  ;;  %v309_v3 = vld [vmem:[%s443_s0] sm:$0xff]  ;;  %132 = vmatpush.bf16.msra.mxu1 %v317_v1  ;;  %v315_v5 = vld [vmem:[%s444_s3 + $0x28] sm:$0xff]  ;;  %v313_v7 = vld [vmem:[%s444_s3 + $0x18] sm:$0xff] }
   0x3   :  { %54 = vmatpush.bf16.msra.mxu0 %v45_v2  ;;  %v314_v6 = vld [vmem:[%s444_s3 + $0x20] sm:$0xff]  ;;  %v312_v8 = vld [vmem:[%s444_s3 + $0x10] sm:$0xff]  ;;  %v311_v9 = vld [vmem:[%s444_s3 + $0x8] sm:$0xff] }
   0x4   :  { %v310_v10 = vld [vmem:[%s444_s3] sm:$0xff]  ;;  %v325_v11 = vld [vmem:[%s447_s5 + $0x38] sm:$0xff]  ;;  %v324_v12 = vld [vmem:[%s447_s5 + $0x30] sm:$0xff] }
   0x5   :  { %217 = vmatpush.bf16.msra.mxu2 %v325_v11  ;;  %v323_v13 = vld [vmem:[%s447_s5 + $0x28] sm:$0xff]  ;;  %v322_v14 = vld [vmem:[%s447_s5 + $0x20] sm:$0xff]  ;;  %v321_v23 = vld [vmem:[%s447_s5 + $0x18] sm:$0xff] }
   0x6   :  { %244 = vmatmul.msk.bf16.vlgmr.msra.gmra.mxu0 %vm39_vm1, %v309_v3  ;;  %133 = vmatpush.bf16.msra.mxu1 %v316_v4  ;;  %v326_v16 = vld [vmem:[%s445_s2] ss:$0 sm:$0xff]  ;;  %v320_v24 = vld [vmem:[%s447_s5 + $0x10] sm:$0xff]  ;;  %v319_v25 = vld [vmem:[%s447_s5 + $0x8] sm:$0xff] }
   0x7   :  { %v318_v26 = vld [vmem:[%s447_s5] sm:$0xff] }
   0x8   :  { %v327_v28 = vld [vmem:[%s446_s4] ss:$0 sm:$0xff] }
   0x9   :  { %218 = vmatpush.bf16.msra.mxu2 %v324_v12  ;;  %v328_v35 = vld [vmem:[%s448_s6] ss:$0 sm:$0xff] }
   0xa   :  { %134 = vmatpush.bf16.msra.mxu1 %v315_v5 }
   0xd   :  { %219 = vmatpush.bf16.msra.mxu2 %v323_v13 }
   0xe   :  { %135 = vmatpush.bf16.msra.mxu1 %v314_v6 }
  0x11   :  { %220 = vmatpush.bf16.msra.mxu2 %v322_v14 }
  0x12   :  { %136 = vmatpush.bf16.msra.mxu1 %v313_v7 }
  0x15   :  { %221 = vmatpush.bf16.msra.mxu2 %v321_v23 }
  0x16   :  { %137 = vmatpush.bf16.msra.mxu1 %v312_v8 }
  0x19   :  { %222 = vmatpush.bf16.msra.mxu2 %v320_v24 }
  0x1a   :  { %138 = vmatpush.bf16.msra.mxu1 %v311_v9 }
  0x1d   :  { %223 = vmatpush.bf16.msra.mxu2 %v319_v25 }
  0x1e   :  { %139 = vmatpush.bf16.msra.mxu1 %v310_v10 }
  0x21   :  { %224 = vmatpush.bf16.msra.mxu2 %v318_v26 }
  0x83   :  { %v56_v15 = vpop.f32.mrf.mxu0 }
  0x84   :  { %v57_v17 = vadd.f32 %v326_v16, %v56_v15 }
  0x86   :  { %v61_v20 = vmax.f32 %v57_v17, 0.0 }
  0x8b   :  { %v58_v18 = vpop.f32.mrf.mxu0 }
  0x8c   :  { %v59_v19 = vadd.f32 %v326_v16, %v58_v18 }
  0x8e   :  { %v62_v21 = vmax.f32 %v59_v19, 0.0 }
  0x90   :  { %v63_v22 = vpack.c.bf16 %v62_v21, %v61_v20 }
  0x92   :  { %140 = vmatmul.bf16.vlgmr.msra.gmra.mxu1 %v63_v22 }
 0x10f   :  { %v141_v27 = vpop.f32.mrf.mxu1 }
 0x110   :  { %v142_v29 = vadd.f32 %v327_v28, %v141_v27 }
 0x112   :  { %v146_v32 = vmax.f32 %v142_v29, 0.0 }
 0x117   :  { %v143_v30 = vpop.f32.mrf.mxu1 }
 0x118   :  { %v144_v31 = vadd.f32 %v327_v28, %v143_v30 }
 0x11a   :  { %v147_v33 = vmax.f32 %v144_v31, 0.0 }
 0x11c   :  { %v148_v34 = vpack.c.bf16 %v147_v33, %v146_v32 }
 0x11e   :  { %225 = vmatmul.bf16.vlgmr.msra.gmra.mxu2 %v148_v34 }
 0x1a1   :  { %v226_v36 = vpop.f32.mrf.mxu2 }
 0x1a2   :  { %v227_v37 = vadd.f32 %v328_v35, %v226_v36 }
 0x1a4   :  { %329 = vtanh.f32 %v227_v37 }
 0x1a9   :  { %v228_v38 = vpop.f32.mrf.mxu2 }
 0x1aa   :  { %v330_v39 = vpop.eup %329  ;;  %v229_v40 = vadd.f32 %v328_v35, %v228_v38 }
 0x1ab   :  { %234 = vst.msk [vmem:[%s449_s7] sm:$0xff] %vm233_vm2, %v330_v39 }
 0x1ac   :  { %331 = vtanh.f32 %v229_v40 }
 0x1b2   :  { %v332_v41 = vpop.eup %331 }
 0x1b3   :  { %235 = vst.msk [vmem:[%s449_s7 + $0x8] sm:$0xff] %vm233_vm2, %v332_v41 }

</bundles_post_ra>
